<compile_context>
chip_gen: v7x
topology: tpu7x:2x2x1
jax: 0.10.0
libtpu: 0.0.40
codegen_flags: <defaults>
</compile_context>

<pallas_src>
import functools

import jax
import jax.numpy as jnp
from jax.experimental import pallas as pl
from jax.experimental.pallas import tpu as pltpu

# Full-f32 matmul accuracy for both the in-kernel MXU dots and the pure-JAX
# reference, so the correctness check below can stay tight.
jax.config.update("jax_default_matmul_precision", "highest")

BN_EPS = 1e-5
H1 = 128          # first hidden width
H2 = 64           # second hidden width (zero-padded to 128 lanes in-kernel)
H2_PAD = 128
TB_TILE = 512                     # batch tile for the large-B two-pass path
SINGLE_PASS_MAX_B = 1024          # whole batch resident -> single-pass kernel
VMEM_LIMIT = 48 * 1024 * 1024     # fits v5e/v6e (128 MiB) and v7x (64 MiB)


def _head(h1n, s2_ref):
    """Shared tail: Linear(128,64)+ReLU (lane-padded) + Linear(64,1)."""
    w2 = s2_ref[0:H1, :]                        # (128, 128), lanes >= 64 are zero
    b2 = s2_ref[H1:H1 + 1, :]                   # (1, 128)
    h2 = jnp.maximum(
        jnp.dot(h1n, w2, preferred_element_type=jnp.float32) + b2, 0.0)
    w3 = s2_ref[H1 + 1:H1 + 2, :]               # (1, 128), lanes >= 64 are zero
    b3 = s2_ref[H1 + 2:H1 + 3, 0:1]             # (1, 1) scalar
    # N=1 output column: VPU multiply + lane reduce instead of N=1 MXU matmul.
    return jnp.sum(h2 * w3, axis=-1, keepdims=True) + b3


def mlp_kernel_single(x_ref, s1_ref, s2_ref, o_ref, *, in_rows):
    """Whole batch in one tile: exact BatchNorm stats in a single pass."""
    x = x_ref[...]                                        # (B, in_rows)
    w1 = s1_ref[0:in_rows, :]
    b1 = s1_ref[in_rows:in_rows + 1, :]
    gamma = s1_ref[in_rows + 8:in_rows + 9, :]
    beta = s1_ref[in_rows + 16:in_rows + 17, :]

    h1 = jnp.maximum(
        jnp.dot(x, w1, preferred_element_type=jnp.float32) + b1, 0.0)
    mean = jnp.mean(h1, axis=0, keepdims=True)
    var = jnp.maximum(
        jnp.mean(h1 * h1, axis=0, keepdims=True) - mean * mean, 0.0)
    scale = gamma * jax.lax.rsqrt(var + BN_EPS)
    shift = beta - mean * scale
    h1n = h1 * scale + shift

    o_ref[...] = _head(h1n, s2_ref)


def mlp_kernel_tiled(x_ref, s1_ref, s2_ref, o_ref,
                     sum_ref, sumsq_ref, scale_ref, shift_ref,
                     *, in_rows, batch_total, tile_rows):
    """Two-pass exact BatchNorm for large batches streamed in 512-row tiles."""
    pass_id = pl.program_id(0)        # 0: accumulate batch stats, 1: compute
    tile_id = pl.program_id(1)        # batch tile

    # Layer 1 (recomputed in both passes; weight slabs stay VMEM-resident).
    x = x_ref[...]                                        # (TB, in_rows)
    w1 = s1_ref[0:in_rows, :]
    b1 = s1_ref[in_rows:in_rows + 1, :]
    h1 = jnp.maximum(
        jnp.dot(x, w1, preferred_element_type=jnp.float32) + b1, 0.0)

    @pl.when(pass_id == 0)
    def _stats_pass():
        @pl.when(tile_id == 0)
        def _init():
            sum_ref[...] = jnp.zeros_like(sum_ref)
            sumsq_ref[...] = jnp.zeros_like(sumsq_ref)

        # Mask batch-padding rows out of the statistics.
        row = (jax.lax.broadcasted_iota(jnp.int32, (tile_rows, 1), 0)
               + tile_id * tile_rows)
        h1m = jnp.where(row < batch_total, h1, 0.0)
        sum_ref[...] += jnp.sum(h1m, axis=0, keepdims=True)
        sumsq_ref[...] += jnp.sum(h1m * h1m, axis=0, keepdims=True)

    @pl.when(pass_id == 1)
    def _compute_pass():
        @pl.when(tile_id == 0)
        def _finalize_stats():
            inv_n = 1.0 / batch_total
            mean = sum_ref[...] * inv_n
            var = jnp.maximum(sumsq_ref[...] * inv_n - mean * mean, 0.0)
            gamma = s1_ref[in_rows + 8:in_rows + 9, :]
            beta = s1_ref[in_rows + 16:in_rows + 17, :]
            scale = gamma * jax.lax.rsqrt(var + BN_EPS)
            scale_ref[...] = scale
            shift_ref[...] = beta - mean * scale

        h1n = h1 * scale_ref[...] + shift_ref[...]
        o_ref[...] = _head(h1n, s2_ref)


def binary_classifier_forward(x, slab1, slab2, in_rows):
    B, IN = x.shape
    if IN < in_rows:                         # pad features to 8-aligned rows
        x = jnp.pad(x, ((0, 0), (0, in_rows - IN)))
    s1_rows = slab1.shape[0]
    s2_rows = slab2.shape[0]
    param_bytes = (slab1.size + slab2.size) * 4

    single_pass = (B <= SINGLE_PASS_MAX_B
                   and B * (in_rows + 3 * H1) * 4 <= 8 * 1024 * 1024)

    if single_pass:
        kernel = functools.partial(mlp_kernel_single, in_rows=in_rows)
        cost = pl.CostEstimate(
            flops=2 * B * (in_rows * H1 + H1 * H2_PAD + H2_PAD) + 6 * B * H1,
            transcendentals=H1,
            bytes_accessed=B * in_rows * 4 + param_bytes + B * 4,
        )
        return pl.pallas_call(
            kernel,
            out_shape=jax.ShapeDtypeStruct((B, 1), jnp.float32),
            grid_spec=pltpu.PrefetchScalarGridSpec(
                num_scalar_prefetch=0,
                grid=(1,),
                in_specs=[
                    pl.BlockSpec((B, in_rows), lambda i: (0, 0)),
                    pl.BlockSpec((s1_rows, H1), lambda i: (0, 0)),
                    pl.BlockSpec((s2_rows, H2_PAD), lambda i: (0, 0)),
                ],
                out_specs=pl.BlockSpec((B, 1), lambda i: (0, 0)),
            ),
            compiler_params=pltpu.CompilerParams(
                dimension_semantics=("arbitrary",),
                vmem_limit_bytes=VMEM_LIMIT,
            ),
            cost_estimate=cost,
        )(x, slab1, slab2)

    # ---- large-B two-pass path: 512-row tiles, exact BN via masked stats ----
    TB = TB_TILE
    B_pad = pl.cdiv(B, TB) * TB
    NT = B_pad // TB
    if B_pad > B:
        x = jnp.pad(x, ((0, B_pad - B), (0, 0)))   # padded rows masked in-kernel

    kernel = functools.partial(
        mlp_kernel_tiled, in_rows=in_rows, batch_total=B, tile_rows=TB)
    cost = pl.CostEstimate(
        flops=2 * B_pad * (2 * in_rows * H1 + H1 * H2_PAD + H2_PAD)
        + 10 * B_pad * H1,
        transcendentals=H1,
        bytes_accessed=2 * B_pad * in_rows * 4 + param_bytes + B_pad * 4,
    )
    out = pl.pallas_call(
        kernel,
        out_shape=jax.ShapeDtypeStruct((B_pad, 1), jnp.float32),
        grid_spec=pltpu.PrefetchScalarGridSpec(
            num_scalar_prefetch=0,
            grid=(2, NT),                                       # (pass, tile)
            in_specs=[
                pl.BlockSpec((TB, in_rows), lambda p, i: (i, 0)),   # stream x
                pl.BlockSpec((s1_rows, H1), lambda p, i: (0, 0)),   # resident
                pl.BlockSpec((s2_rows, H2_PAD), lambda p, i: (0, 0)),
            ],
            # Pass 0 parks the output window on block 0 (never written there);
            # pass 1 writes every block exactly once with final data.
            out_specs=pl.BlockSpec((TB, 1), lambda p, i: (i * p, 0)),
            scratch_shapes=[pltpu.VMEM((1, H1), jnp.float32)] * 4,
        ),
        compiler_params=pltpu.CompilerParams(
            # Batch axis must stay sequential: BN stats are a cross-tile
            # reduction feeding pass 1.
            dimension_semantics=("arbitrary", "arbitrary"),
            vmem_limit_bytes=VMEM_LIMIT,
        ),
        cost_estimate=cost,
    )(x, slab1, slab2)
    return out[:B]


def init_params(key, input_size):
    """PyTorch-style init.  Linear weights stored transposed (in, out)."""
    ks = jax.random.split(key, 6)

    def linear(kw, kb, fan_in, fan_out):
        bound = 1.0 / jnp.sqrt(fan_in)
        w = jax.random.uniform(kw, (fan_in, fan_out), jnp.float32, -bound, bound)
        b = jax.random.uniform(kb, (1, fan_out), jnp.float32, -bound, bound)
        return w, b

    w1, b1 = linear(ks[0], ks[1], input_size, H1)
    w2, b2 = linear(ks[2], ks[3], H1, H2)
    w3, b3 = linear(ks[4], ks[5], H2, 1)
    gamma = jnp.ones((1, H1), jnp.float32)     # BatchNorm1d weight init
    beta = jnp.zeros((1, H1), jnp.float32)     # BatchNorm1d bias init
    return (w1, b1, gamma, beta, w2, b2, w3, b3)


def pack_params(params, input_size):
    """Pack all parameters into 2 lane-dense (., 128) f32 slabs.

    slab1: [w1 rows 0..in_rows) | b1 @ in_rows | gamma @ in_rows+8 |
            beta @ in_rows+16]   (all segments 8-sublane aligned)
    slab2: [w2 (128,128, lanes>=64 zero) | b2 row | w3 row | b3 at [H1+2, 0]]
    """
    w1, b1, gamma, beta, w2, b2, w3, b3 = params
    in_rows = max(8, ((input_size + 7) // 8) * 8)

    slab1 = jnp.zeros((in_rows + 24, H1), jnp.float32)
    slab1 = slab1.at[:input_size, :].set(w1)
    slab1 = slab1.at[in_rows, :].set(b1.reshape(H1))
    slab1 = slab1.at[in_rows + 8, :].set(gamma.reshape(H1))
    slab1 = slab1.at[in_rows + 16, :].set(beta.reshape(H1))

    slab2 = jnp.zeros((H1 + 3, H2_PAD), jnp.float32)
    slab2 = slab2.at[:H1, :H2].set(w2)
    slab2 = slab2.at[H1, :H2].set(b2.reshape(H2))
    slab2 = slab2.at[H1 + 1, :H2].set(w3.reshape(H2))
    slab2 = slab2.at[H1 + 2, 0].set(jnp.asarray(b3, jnp.float32).reshape(()))
    return slab1, slab2, in_rows


def reference_forward(x, params):
    """Pure-JAX reference with training-mode BatchNorm1d semantics."""
    w1, b1, gamma, beta, w2, b2, w3, b3 = params
    h1 = jnp.maximum(x @ w1 + b1, 0.0)
    mu = jnp.mean(h1, axis=0, keepdims=True)
    var = jnp.mean((h1 - mu) ** 2, axis=0, keepdims=True)
    h1n = (h1 - mu) / jnp.sqrt(var + BN_EPS) * gamma + beta
    h2 = jnp.maximum(h1n @ w2 + b2, 0.0)
    return h2 @ w3 + b3


if __name__ == "__main__":
    key = jax.random.PRNGKey(0)
    input_size = 32
    batch = 8

    kx, kp, kx2 = jax.random.split(key, 3)
    params = init_params(kp, input_size)
    slab1, slab2, in_rows = pack_params(params, input_size)

    # Small batch -> single-pass fast path.
    x = jax.random.normal(kx, (batch, input_size), jnp.float32)
    out = binary_classifier_forward(x, slab1, slab2, in_rows)
    jax.block_until_ready(out)
    assert out.shape == (batch, 1), out.shape
    ref = reference_forward(x, params)
    err = float(jnp.max(jnp.abs(out - ref)))
    assert jnp.allclose(out, ref, atol=2e-4, rtol=2e-4), err

    # Larger batch -> tiled two-pass path (exercises 512-row tiles, batch
    # padding 1600 -> 2048 with masked BN statistics).
    big_batch = 1600
    x_big = jax.random.normal(kx2, (big_batch, input_size), jnp.float32)
    out_big = binary_classifier_forward(x_big, slab1, slab2, in_rows)
    jax.block_until_ready(out_big)
    assert out_big.shape == (big_batch, 1), out_big.shape
    ref_big = reference_forward(x_big, params)
    err_big = float(jnp.max(jnp.abs(out_big - ref_big)))
    assert jnp.allclose(out_big, ref_big, atol=5e-4, rtol=5e-4), err_big

    print("KERNEL_OK")
</pallas_src>

<mosaic_0001>
module attributes {stable_mosaic.version = 11 : i64} {
  func.func @mlp_kernel_single(%arg0: i32, %arg1: memref<8x32xf32, #tpu.memory_space<vmem>>, %arg2: memref<56x128xf32, #tpu.memory_space<vmem>>, %arg3: memref<131x128xf32, #tpu.memory_space<vmem>>, %arg4: memref<8x1xf32, #tpu.memory_space<vmem>>) attributes {dimension_semantics = [#tpu.dimension_semantics<arbitrary>], iteration_bounds = array<i64: 1>, scalar_prefetch = 0 : i64, scratch_operands = 0 : i64, tpu.core_type = #tpu.core_type<tc>, window_params = [{pipeline_mode = #tpu.pipeline_mode<synchronous>, transform_indices = @transform_0, window_bounds = array<i64: 8, 32>}, {pipeline_mode = #tpu.pipeline_mode<synchronous>, transform_indices = @transform_1, window_bounds = array<i64: 56, 128>}, {pipeline_mode = #tpu.pipeline_mode<synchronous>, transform_indices = @transform_2, window_bounds = array<i64: 131, 128>}, {pipeline_mode = #tpu.pipeline_mode<synchronous>, transform_indices = @transform_3, window_bounds = array<i64: 8, 1>}]} {
    %c0 = arith.constant 0 : index
    %c0_0 = arith.constant 0 : index
    %0 = vector.load %arg1[%c0, %c0_0] : memref<8x32xf32, #tpu.memory_space<vmem>>, vector<8x32xf32>
    %c0_1 = arith.constant 0 : index
    %c0_2 = arith.constant 0 : index
    %1 = vector.load %arg2[%c0_1, %c0_2] : memref<56x128xf32, #tpu.memory_space<vmem>>, vector<32x128xf32>
    %c32 = arith.constant 32 : index
    %c0_3 = arith.constant 0 : index
    %2 = vector.load %arg2[%c32, %c0_3] : memref<56x128xf32, #tpu.memory_space<vmem>>, vector<1x128xf32>
    %c40 = arith.constant 40 : index
    %c0_4 = arith.constant 0 : index
    %3 = vector.load %arg2[%c40, %c0_4] : memref<56x128xf32, #tpu.memory_space<vmem>>, vector<1x128xf32>
    %c48 = arith.constant 48 : index
    %c0_5 = arith.constant 0 : index
    %4 = vector.load %arg2[%c48, %c0_5] : memref<56x128xf32, #tpu.memory_space<vmem>>, vector<1x128xf32>
    %cst = arith.constant dense<0.000000e+00> : vector<8x128xf32>
    %5 = tpu.matmul %0, %1, %cst {dimension_numbers = #tpu.dot_dimension_numbers<[1], [0], [0], [1], [0, 0, 1, 1], [], []>, precision = #tpu.contract_precision<fp32>} : vector<8x32xf32>, vector<32x128xf32>, vector<8x128xf32> -> vector<8x128xf32>
    %6 = vector.broadcast %2 : vector<1x128xf32> to vector<8x128xf32>
    %7 = arith.addf %5, %6 : vector<8x128xf32>
    %cst_6 = arith.constant 0.000000e+00 : f32
    %8 = vector.broadcast %cst_6 : f32 to vector<8x128xf32>
    %9 = arith.maximumf %7, %8 : vector<8x128xf32>
    %cst_7 = arith.constant dense<0.000000e+00> : vector<128xf32>
    %10 = vector.multi_reduction <add>, %9, %cst_7 [0] : vector<8x128xf32> to vector<128xf32>
    %11 = vector.shape_cast %10 : vector<128xf32> to vector<1x128xf32>
    %cst_8 = arith.constant 8.000000e+00 : f32
    %12 = vector.broadcast %cst_8 : f32 to vector<1x128xf32>
    %13 = arith.divf %11, %12 : vector<1x128xf32>
    %14 = arith.mulf %9, %9 : vector<8x128xf32>
    %cst_9 = arith.constant dense<0.000000e+00> : vector<128xf32>
    %15 = vector.multi_reduction <add>, %14, %cst_9 [0] : vector<8x128xf32> to vector<128xf32>
    %16 = vector.shape_cast %15 : vector<128xf32> to vector<1x128xf32>
    %cst_10 = arith.constant 8.000000e+00 : f32
    %17 = vector.broadcast %cst_10 : f32 to vector<1x128xf32>
    %18 = arith.divf %16, %17 : vector<1x128xf32>
    %19 = arith.mulf %13, %13 : vector<1x128xf32>
    %20 = arith.subf %18, %19 : vector<1x128xf32>
    %cst_11 = arith.constant 0.000000e+00 : f32
    %21 = vector.broadcast %cst_11 : f32 to vector<1x128xf32>
    %22 = arith.maximumf %20, %21 : vector<1x128xf32>
    %cst_12 = arith.constant 9.99999974E-6 : f32
    %23 = vector.broadcast %cst_12 : f32 to vector<1x128xf32>
    %24 = arith.addf %22, %23 : vector<1x128xf32>
    %25 = math.rsqrt %24 : vector<1x128xf32>
    %26 = arith.mulf %3, %25 : vector<1x128xf32>
    %27 = arith.mulf %13, %26 : vector<1x128xf32>
    %28 = arith.subf %4, %27 : vector<1x128xf32>
    %29 = vector.broadcast %26 : vector<1x128xf32> to vector<8x128xf32>
    %30 = arith.mulf %9, %29 : vector<8x128xf32>
    %31 = vector.broadcast %28 : vector<1x128xf32> to vector<8x128xf32>
    %32 = arith.addf %30, %31 : vector<8x128xf32>
    %c0_13 = arith.constant 0 : index
    %c0_14 = arith.constant 0 : index
    %33 = vector.load %arg3[%c0_13, %c0_14] : memref<131x128xf32, #tpu.memory_space<vmem>>, vector<128x128xf32>
    %c128 = arith.constant 128 : index
    %c0_15 = arith.constant 0 : index
    %34 = vector.load %arg3[%c128, %c0_15] : memref<131x128xf32, #tpu.memory_space<vmem>>, vector<1x128xf32>
    %cst_16 = arith.constant dense<0.000000e+00> : vector<8x128xf32>
    %35 = tpu.matmul %32, %33, %cst_16 {dimension_numbers = #tpu.dot_dimension_numbers<[1], [0], [0], [1], [0, 0, 1, 1], [], []>, precision = #tpu.contract_precision<fp32>} : vector<8x128xf32>, vector<128x128xf32>, vector<8x128xf32> -> vector<8x128xf32>
    %36 = vector.broadcast %34 : vector<1x128xf32> to vector<8x128xf32>
    %37 = arith.addf %35, %36 : vector<8x128xf32>
    %cst_17 = arith.constant 0.000000e+00 : f32
    %38 = vector.broadcast %cst_17 : f32 to vector<8x128xf32>
    %39 = arith.maximumf %37, %38 : vector<8x128xf32>
    %c129 = arith.constant 129 : index
    %c0_18 = arith.constant 0 : index
    %40 = vector.load %arg3[%c129, %c0_18] : memref<131x128xf32, #tpu.memory_space<vmem>>, vector<1x128xf32>
    %c130 = arith.constant 130 : index
    %c0_19 = arith.constant 0 : index
    %41 = vector.load %arg3[%c130, %c0_19] : memref<131x128xf32, #tpu.memory_space<vmem>>, vector<1x1xf32>
    %42 = vector.broadcast %40 : vector<1x128xf32> to vector<8x128xf32>
    %43 = arith.mulf %39, %42 : vector<8x128xf32>
    %cst_20 = arith.constant dense<0.000000e+00> : vector<8xf32>
    %44 = vector.multi_reduction <add>, %43, %cst_20 [1] : vector<8x128xf32> to vector<8xf32>
    %45 = vector.shape_cast %44 : vector<8xf32> to vector<8x1xf32>
    %46 = vector.broadcast %41 : vector<1x1xf32> to vector<8x1xf32>
    %47 = arith.addf %45, %46 : vector<8x1xf32>
    %c0_21 = arith.constant 0 : index
    %c0_22 = arith.constant 0 : index
    %48 = vector.load %arg4[%c0_21, %c0_22] : memref<8x1xf32, #tpu.memory_space<vmem>>, vector<8x1xf32>
    tpu.vector_store %arg4[%c0_21, %c0_22], %47 {strides = array<i32>} : memref<8x1xf32, #tpu.memory_space<vmem>>, vector<8x1xf32>,
    return
  }
  func.func @transform_0(%arg0: i32) -> (i32, i32) {
    %c0_i32 = arith.constant 0 : i32
    %c0_i32_0 = arith.constant 0 : i32
    %c0_i32_1 = arith.constant 0 : i32
    return %c0_i32, %c0_i32_0 : i32, i32
  }
  func.func @transform_1(%arg0: i32) -> (i32, i32) {
    %c0_i32 = arith.constant 0 : i32
    %c0_i32_0 = arith.constant 0 : i32
    %c0_i32_1 = arith.constant 0 : i32
    return %c0_i32, %c0_i32_0 : i32, i32
  }
  func.func @transform_2(%arg0: i32) -> (i32, i32) {
    %c0_i32 = arith.constant 0 : i32
    %c0_i32_0 = arith.constant 0 : i32
    %c0_i32_1 = arith.constant 0 : i32
    return %c0_i32, %c0_i32_0 : i32, i32
  }
  func.func @transform_3(%arg0: i32) -> (i32, i32) {
    %c0_i32 = arith.constant 0 : i32
    %c0_i32_0 = arith.constant 0 : i32
    %c0_i32_1 = arith.constant 0 : i32
    return %c0_i32, %c0_i32_0 : i32, i32
  }
}

</mosaic_0001>

<bundles_post_ra>
// kernel: tpu_custom_call.1
= control target key start
LH: loop header
LB: loop body
LE: loop exit
PB: predicated region body
PF: predicated region fallthrough
CT: control target
= control target key end

     0   :  { %8 = vsyncpa [#allocation3], 0  ;;  %s2298_s0 = inlined_call_operand.hbm [shape: f32[8,32], index: 0, kind: input, shape index: {}]   ;;  %s2299_s1 = inlined_call_operand.hbm [shape: f32[56,128], index: 1, kind: input, shape index: {}]   ;;  %s2300_s2 = inlined_call_operand.hbm [shape: f32[131,128], index: 2, kind: input, shape index: {}]   ;;  %s2301_s3 = inlined_call_operand.vmem [shape: f32[8,1], index: 3, kind: output, shape index: {}]  }
   0x1   :  { %9 = vsyncpa [#allocation5], 0  ;;  %s1967_s12 = smov [#allocation4]   ;;  %s1897_s16 = scalar_lea.hbm %s2299_s1, 896 }
   0x2   :  { %s25_s13 = sshll.u32 %s1967_s12, 4  ;;  %p1898_p0 = scmp.ne.s32.totalorder %s2299_s1, %s1897_s16  ;;  %s26_s13 = int_to_ptr.vmem [resolvable:$true] %s25_s13 }
   0x3   :  { %p1901_p1 = scmp.lt.u32.totalorder %s1897_s16, %s2299_s1 }
   0x5   :  { %p1903_p2 = pnand %p1901_p1, %p1898_p0 }
   0x7   :  { %1906 = shalt.err (!%p1903_p2)
}
   0x8   :  { %s1907_s21 = scalar_lea.vmem %s26_s13, 896  ;;  %p1912_p4 = scmp.lt.s32.totalorder %s26_s13, %s26_s13 }
   0x9   :  { %p1908_p3 = scmp.ne.s32.totalorder %s26_s13, %s1907_s21  ;;  %p1913_p5 = scmp.lt.s32.totalorder %s1907_s21, %s1907_s21 }
   0xb   :  { %p1914_p6 = por %p1913_p5, %p1912_p4 }
   0xd   :  { %p1915_p7 = pnand %p1914_p6, %p1908_p3 }
   0xf   :  { %1918 = shalt.err (!%p1915_p7)
}
  0x10   :  { %s1968_s22 = smov 128   ;;  %s1969_s23 = smov 8  }
  0x11   :  { %31 = dma.hbm_to_vmem [thread:$0]  %s2299_s1, 896, %s26_s13, [#allocation5], %s1968_s22, %s1968_s22, %s1969_s23  }
  0x12   :  { %s1970_s26 = smov [#allocation2]   ;;  %s1971_s28 = smov [#allocation6]  }
  0x13   :  { %s16_s27 = sshll.u32 %s1970_s26, 4  ;;  %s37_s29 = sshll.u32 %s1971_s28, 4  ;;  %s17_s27 = int_to_ptr.vmem [resolvable:$true] %s16_s27  ;;  %s38_s29 = int_to_ptr.vmem [resolvable:$true] %s37_s29 }
  0x14   :  { %s1919_s5 = scalar_lea.hbm %s2298_s0, 128 }
  0x15   :  { %p1920_p8 = scmp.ne.s32.totalorder %s2298_s0, %s1919_s5  ;;  %p1923_p9 = scmp.lt.u32.totalorder %s1919_s5, %s2298_s0 }
  0x17   :  { %p1925_p10 = pnand %p1923_p9, %p1920_p8 }
  0x19   :  { %1928 = shalt.err (!%p1925_p10)
}
  0x1a   :  { %s1929_s1 = scalar_lea.vmem %s17_s27, 128  ;;  %p1934_p12 = scmp.lt.s32.totalorder %s17_s27, %s17_s27 }
  0x1b   :  { %p1930_p11 = scmp.ne.s32.totalorder %s17_s27, %s1929_s1  ;;  %p1935_p13 = scmp.lt.s32.totalorder %s1929_s1, %s1929_s1 }
  0x1d   :  { %p1936_p0 = por %p1935_p13, %p1934_p12 }
  0x1f   :  { %p1937_p1 = pnand %p1936_p0, %p1930_p11 }
  0x21   :  { %1940 = shalt.err (!%p1937_p1)
}
  0x22   :  { %19 = dma.hbm_to_vmem [thread:$0]  %s2298_s0, 128, %s17_s27, [#allocation3]  }
  0x23   :  { %s1941_s14 = scalar_lea.hbm %s2300_s2, 2176 }
  0x24   :  { %p1942_p2 = scmp.ne.s32.totalorder %s2300_s2, %s1941_s14  ;;  %p1945_p3 = scmp.lt.u32.totalorder %s1941_s14, %s2300_s2 }
  0x26   :  { %p1947_p4 = pnand %p1945_p3, %p1942_p2 }
  0x28   :  { %1950 = shalt.err (!%p1947_p4)
}
  0x29   :  { %s1951_s19 = scalar_lea.vmem %s38_s29, 2176  ;;  %p1956_p6 = scmp.lt.s32.totalorder %s38_s29, %s38_s29 }
  0x2a   :  { %p1952_p5 = scmp.ne.s32.totalorder %s38_s29, %s1951_s19  ;;  %p1957_p7 = scmp.lt.s32.totalorder %s1951_s19, %s1951_s19 }
  0x2c   :  { %p1958_p8 = por %p1957_p7, %p1956_p6 }
  0x2e   :  { %p1959_p9 = pnand %p1958_p8, %p1952_p5 }
  0x30   :  { %1962 = shalt.err (!%p1959_p9)
}
  0x31   :  { %43 = dma.hbm_to_vmem [thread:$0]  %s2300_s2, 2176, %s38_s29, [#allocation5], %s1968_s22, %s1968_s22, %s1969_s23  }
  0x32   :  { %1963 = dma.done.wait [#allocation3], 128  }
  0x33   :  { %1964 = vsyncadd [#allocation3], 4294967168 }
  0x34   :  { %1965 = dma.done.wait [#allocation5], 3072  }
  0x35   :  { %1966 = vsyncadd [#allocation5], 4294964224  ;;  %v1972_v0 = vmov 0.0|0.0   ;;  %vm1973_vm0 = vmmov 0   ;;  %v1974_v1 = vmov 0.0   ;;  %vm65_vm1 = vcmask 261120  }
  0x36   :  { %1686 = vmatprep.subr.bf16.mxu0 %v1972_v0  ;;  %1418 = vmatprep.mubr.msk.f32.mxu0 %vm1973_vm0, %v1974_v1  ;;  %v54_v2 = vld [vmem:[#allocation4] sm:$0xff]  ;;  %v55_v3 = vld [vmem:[#allocation4 + $0x8] sm:$0xff]  ;;  %v56_v4 = vld [vmem:[#allocation4 + $0x10] sm:$0xff]  ;;  %vm1266_vm2 = vcmask 7168  }
  0x37   :  { %1770 = vmatprep.subr.bf16.mxu1 %v1972_v0  ;;  %1578 = vmatprep.mubr.msk.f32.mxu1 %vm1973_vm0, %v1974_v1  ;;  %v70_v5 = vand.u32 4294901760, %v54_v2  ;;  %v73_v6 = vand.u32 4294901760, %v55_v3  ;;  %v57_v7 = vld [vmem:[#allocation4 + $0x18] sm:$0xff]  ;;  %v76_v8 = vand.u32 4294901760, %v56_v4  ;;  %v590_v42 = vld [vmem:[#allocation6 + $0x8] sm:$0xff]  ;;  %v591_v47 = vld [vmem:[#allocation6 + $0x10] sm:$0xff] }
  0x38   :  { %v53_v9 = vld [vmem:[#allocation2] sm:$0xff]  ;;  %v79_v10 = vand.u32 4294901760, %v57_v7  ;;  %v614_v44 = vand.u32 4294901760, %v590_v42  ;;  %v592_v48 = vld [vmem:[#allocation6 + $0x18] sm:$0xff]  ;;  %v617_v50 = vand.u32 4294901760, %v591_v47  ;;  %v594_v55 = vld [vmem:[#allocation6 + $0x28] sm:$0xff] }
  0x39   :  { %v67_v11 = vsel %vm65_vm1, %v53_v9, 0  ;;  %v1687_v12 = vpack.c.bf16 %v73_v6, %v70_v5  ;;  %v150_v13 = vsub.f32 %v54_v2, %v70_v5  ;;  %v157_v14 = vsub.f32 %v55_v3, %v73_v6  ;;  %v589_v41 = vld [vmem:[#allocation6] sm:$0xff]  ;;  %v595_v62 = vld [vmem:[#allocation6 + $0x30] sm:$0xff]  ;;  %v596_v63 = vld [vmem:[#allocation6 + $0x38] sm:$0xff] }
  0x3a   :  { %v164_v15 = vsub.f32 %v56_v4, %v76_v8  ;;  %v171_v16 = vsub.f32 %v57_v7, %v79_v10  ;;  %v138_v17 = vand.u32 4294901760, %v67_v11  ;;  %v1690_v18 = vpack.c.bf16 %v79_v10, %v76_v8  ;;  %v593_v54 = vld [vmem:[#allocation6 + $0x20] sm:$0xff]  ;;  %v598_v7 = vld [vmem:[#allocation6 + $0x48] sm:$0xff]  ;;  %v599_v8 = vld [vmem:[#allocation6 + $0x50] sm:$0xff] }
  0x3b   :  { %1688 = vmatpush3.bf16.msra.mxu0 %v1687_v12  ;;  %v151_v19 = vand.u32 4294901760, %v150_v13  ;;  %v158_v20 = vand.u32 4294901760, %v157_v14  ;;  %v1699_v37 = vpack.c.bf16 %v157_v14, %v150_v13  ;;  %v611_v43 = vand.u32 4294901760, %v589_v41  ;;  %v597_v6 = vld [vmem:[#allocation6 + $0x40] sm:$0xff] }
  0x3c   :  { %v165_v21 = vand.u32 4294901760, %v164_v15  ;;  %1689 = vmatprep.subr.bf16.mxu0 %v1972_v0  ;;  %v139_v22 = vsub.f32 %v67_v11, %v138_v17  ;;  %v172_v23 = vand.u32 4294901760, %v171_v16  ;;  %v1702_v38 = vpack.c.bf16 %v171_v16, %v164_v15 }
  0x3d   :  { %v152_v24 = vsub.f32 %v150_v13, %v151_v19  ;;  %v159_v25 = vsub.f32 %v157_v14, %v158_v20  ;;  %v1711_v39 = vpack.c.bf16 %v158_v20, %v151_v19  ;;  %v2067_v45 = vsub.f32 %v589_v41, %v611_v43  ;;  %v600_v13 = vld [vmem:[#allocation6 + $0x58] sm:$0xff]  ;;  %v601_v14 = vld [vmem:[#allocation6 + $0x60] sm:$0xff] }
  0x3e   :  { %v166_v26 = vsub.f32 %v164_v15, %v165_v21  ;;  %v140_v27 = vand.u32 4294901760, %v139_v22  ;;  %v173_v28 = vsub.f32 %v171_v16, %v172_v23  ;;  %v1714_v40 = vpack.c.bf16 %v172_v23, %v165_v21 }
  0x3f   :  { %1691 = vmatpush3.bf16.msra.mxu0 %v1690_v18  ;;  %v153_v29 = vand.u32 4294901760, %v152_v24  ;;  %v160_v30 = vand.u32 4294901760, %v159_v25  ;;  %v2069_v46 = vsub.f32 %v590_v42, %v614_v44  ;;  %v620_v51 = vand.u32 4294901760, %v592_v48 }
  0x40   :  { %v141_v31 = vsub.f32 %v139_v22, %v140_v27  ;;  %1692 = vmatprep.subr.bf16.mxu0 %v1972_v0  ;;  %v167_v33 = vand.u32 4294901760, %v166_v26  ;;  %v174_v34 = vand.u32 4294901760, %v173_v28  ;;  %v2073_v52 = vsub.f32 %v591_v47, %v617_v50  ;;  %v604_v28 = vld [vmem:[#allocation6 + $0x78] sm:$0xff] }
  0x41   :  { %v1693_v32 = vpack.c.bf16 %v160_v30, %v153_v29  ;;  %v1771_v49 = vpack.c.bf16 %v2069_v46, %v2067_v45  ;;  %v2075_v53 = vsub.f32 %v592_v48, %v620_v51  ;;  %v623_v57 = vand.u32 4294901760, %v593_v54 }
  0x42   :  { %v142_v35 = vand.u32 4294901760, %v141_v31  ;;  %v1696_v36 = vpack.c.bf16 %v174_v34, %v167_v33  ;;  %v626_v58 = vand.u32 4294901760, %v594_v55  ;;  %v2080_v59 = vpack.c.bf16 %v614_v44, %v611_v43 }
  0x43   :  { %1772 = vmatpush3.bf16.msra.mxu1 %v1771_v49  ;;  %v1774_v56 = vpack.c.bf16 %v2075_v53, %v2073_v52  ;;  %v2082_v60 = vsub.f32 %v593_v54, %v623_v57  ;;  %v629_v3 = vand.u32 4294901760, %v595_v62  ;;  %v632_v4 = vand.u32 4294901760, %v596_v63 }
  0x44   :  { %1419 = vmatmul.mubr.f32.vlgmr.msra.gmra.mrb[0].mxu0 %v142_v35  ;;  %1773 = vmatprep.subr.bf16.mxu1 %v1972_v0  ;;  %v2084_v61 = vsub.f32 %v594_v55, %v626_v58  ;;  %v2091_v5 = vpack.c.bf16 %v620_v51, %v617_v50  ;;  %v635_v11 = vand.u32 4294901760, %v597_v6  ;;  %v641_v15 = vand.u32 4294901760, %v599_v8 }
  0x45   :  { %1694 = vmatpush3.bf16.msra.mxu0 %v1693_v32  ;;  %1429 = vmatprep.mubr.msk.f32.mxu0 %vm1973_vm0, %v1974_v1  ;;  %v2093_v9 = vsub.f32 %v595_v62, %v629_v3  ;;  %v2095_v10 = vsub.f32 %v596_v63, %v632_v4  ;;  %v644_v16 = vand.u32 4294901760, %v600_v13  ;;  %v2101_v19 = vpack.c.bf16 %v626_v58, %v623_v57 }
  0x46   :  { %1695 = vmatprep.subr.bf16.mxu0 %v1972_v0  ;;  %v1777_v2 = vpack.c.bf16 %v2084_v61, %v2082_v60  ;;  %v2103_v20 = vsub.f32 %v597_v6, %v635_v11  ;;  %v2110_v24 = vsub.f32 %v599_v8, %v641_v15  ;;  %v2116_v29 = vpack.c.bf16 %v632_v4, %v629_v3 }
  0x47   :  { %1775 = vmatpush3.bf16.msra.mxu1 %v1774_v56  ;;  %v2112_v25 = vsub.f32 %v600_v13, %v644_v16  ;;  %v656_v34 = vand.u32 4294901760, %v604_v28  ;;  %v704_v42 = vand.u32 4294901760, %v2067_v45  ;;  %v711_v43 = vand.u32 4294901760, %v2069_v46 }
  0x48   :  { %1776 = vmatprep.subr.bf16.mxu1 %v1972_v0  ;;  %v718_v51 = vand.u32 4294901760, %v2073_v52  ;;  %v725_v54 = vand.u32 4294901760, %v2075_v53  ;;  %v739_v62 = vand.u32 4294901760, %v2084_v61 }
  0x49   :  { %1697 = vmatpush3.bf16.msra.mxu0 %v1696_v36  ;;  %v1786_v31 = vpack.c.bf16 %v2112_v25, %v2110_v24  ;;  %v705_v47 = vsub.f32 %v2067_v45, %v704_v42  ;;  %v712_v48 = vsub.f32 %v2069_v46, %v711_v43  ;;  %v732_v46 = vand.u32 4294901760, %v2082_v60 }
  0x4a   :  { %1698 = vmatprep.subr.bf16.mxu0 %v1972_v0  ;;  %v719_v56 = vsub.f32 %v2073_v52, %v718_v51  ;;  %v726_v57 = vsub.f32 %v2075_v53, %v725_v54  ;;  %v740_v3 = vsub.f32 %v2084_v61, %v739_v62  ;;  %v753_v52 = vand.u32 4294901760, %v2095_v10 }
  0x4b   :  { %1778 = vmatpush3.bf16.msra.mxu1 %v1777_v2  ;;  %v706_v49 = vand.u32 4294901760, %v705_v47  ;;  %v713_v50 = vand.u32 4294901760, %v712_v48  ;;  %v733_v2 = vsub.f32 %v2082_v60, %v732_v46 }
  0x4c   :  { %1430 = vmatmul.mubr.f32.vlgmr.msra.gmra.mrb[0].mxu0 %v138_v17  ;;  %1779 = vmatprep.subr.bf16.mxu1 %v1972_v0  ;;  %v720_v58 = vand.u32 4294901760, %v719_v56  ;;  %v727_v45 = vand.u32 4294901760, %v726_v57  ;;  %v741_v6 = vand.u32 4294901760, %v740_v3 }
  0x4d   :  { %1700 = vmatpush3.bf16.msra.mxu0 %v1699_v37  ;;  %1440 = vmatprep.mubr.msk.f32.mxu0 %vm1973_vm0, %v1974_v1  ;;  %v2161_v55 = vpack.c.bf16 %v713_v50, %v706_v49  ;;  %v734_v4 = vand.u32 4294901760, %v733_v2  ;;  %v2201_v50 = vpack.c.bf16 %v711_v43, %v704_v42 }
  0x4e   :  { %1701 = vmatprep.subr.bf16.mxu0 %v1972_v0  ;;  %v2167_v63 = vpack.c.bf16 %v727_v45, %v720_v58 }
  0x4f   :  { %v2173_v8 = vpack.c.bf16 %v741_v6, %v734_v4 }
  0x51   :  { %1703 = vmatpush3.bf16.msra.mxu0 %v1702_v38  ;;  %v2134_v38 = vsub.f32 %v604_v28, %v656_v34 }
  0x52   :  { %1704 = vmatprep.subr.bf16.mxu0 %v1972_v0 }
  0x54   :  { %1441 = vmatmul.mubr.f32.vlgmr.msra.gmra.mrb[0].mxu0 %v139_v22  ;;  %v647_v22 = vand.u32 4294901760, %v601_v14 }
  0x55   :  { %1706 = vmatpush3.bf16.msra.mxu0 %v1687_v12  ;;  %1451 = vmatprep.mubr.msk.f32.mxu0 %vm1973_vm0, %v1974_v1 }
  0x56   :  { %1707 = vmatprep.subr.bf16.mxu0 %v1972_v0  ;;  %v2119_v30 = vsub.f32 %v601_v14, %v647_v22  ;;  %v760_v14 = vand.u32 4294901760, %v2103_v20 }
  0x58   :  { %v761_v61 = vsub.f32 %v2103_v20, %v760_v14 }
  0x59   :  { %1709 = vmatpush3.bf16.msra.mxu0 %v1690_v18 }
  0x5a   :  { %1710 = vmatprep.subr.bf16.mxu0 %v1972_v0 }
  0x5c   :  { %1452 = vmatmul.mubr.f32.vlgmr.msra.gmra.mrb[0].mxu0 %v140_v27  ;;  %v603_v27 = vld [vmem:[#allocation6 + $0x70] sm:$0xff] }
  0x5d   :  { %1712 = vmatpush3.bf16.msra.mxu0 %v1711_v39  ;;  %1462 = vmatprep.mubr.msk.f32.mxu0 %vm1973_vm0, %v1974_v1  ;;  %v653_v33 = vand.u32 4294901760, %v603_v27  ;;  %v2138_v39 = vpack.c.bf16 %v644_v16, %v641_v15 }
  0x5e   :  { %1713 = vmatprep.subr.bf16.mxu0 %v1972_v0 }
  0x5f   :  { %v2132_v37 = vsub.f32 %v603_v27, %v653_v33  ;;  %v2153_v44 = vpack.c.bf16 %v656_v34, %v653_v33 }
  0x61   :  { %1715 = vmatpush3.bf16.msra.mxu0 %v1714_v40  ;;  %v1792_v40 = vpack.c.bf16 %v2134_v38, %v2132_v37  ;;  %v802_v47 = vand.u32 4294901760, %v2132_v37 }
  0x62   :  { %1716 = vmatprep.subr.bf16.mxu0 %v1972_v0 }
  0x64   :  { %1463 = vmatmul.mubr.f32.vlgmr.msra.gmra.mrb[0].mxu0 %v138_v17 }
  0x65   :  { %1718 = vmatpush3.bf16.msra.mxu0 %v1687_v12  ;;  %1473 = vmatprep.mubr.msk.f32.mxu0 %vm1973_vm0, %v1974_v1  ;;  %v638_v12 = vand.u32 4294901760, %v598_v7 }
  0x66   :  { %1719 = vmatprep.subr.bf16.mxu0 %v1972_v0 }
  0x67   :  { %v2105_v21 = vsub.f32 %v598_v7, %v638_v12  ;;  %v2127_v35 = vpack.c.bf16 %v638_v12, %v635_v11  ;;  %v746_v7 = vand.u32 4294901760, %v2093_v9  ;;  %v754_v11 = vsub.f32 %v2095_v10, %v753_v52 }
  0x69   :  { %1721 = vmatpush3.bf16.msra.mxu0 %v1690_v18  ;;  %v1780_v18 = vpack.c.bf16 %v2095_v10, %v2093_v9  ;;  %v1783_v23 = vpack.c.bf16 %v2105_v21, %v2103_v20  ;;  %v747_v53 = vsub.f32 %v2093_v9, %v746_v7  ;;  %v755_v13 = vand.u32 4294901760, %v754_v11 }
  0x6a   :  { %1722 = vmatprep.subr.bf16.mxu0 %v1972_v0  ;;  %v767_v60 = vand.u32 4294901760, %v2105_v21  ;;  %v781_v9 = vand.u32 4294901760, %v2112_v25  ;;  %v2209_v45 = vpack.c.bf16 %v753_v52, %v746_v7 }
  0x6b   :  { %1781 = vmatpush3.bf16.msra.mxu1 %v1780_v18  ;;  %v748_v12 = vand.u32 4294901760, %v747_v53 }
  0x6c   :  { %1474 = vmatmul.mubr.f32.vlgmr.msra.gmra.mrb[0].mxu0 %v138_v17  ;;  %v602_v17 = vld [vmem:[#allocation6 + $0x68] sm:$0xff]  ;;  %1782 = vmatprep.subr.bf16.mxu1 %v1972_v0  ;;  %v768_v16 = vsub.f32 %v2105_v21, %v767_v60  ;;  %v2211_v2 = vpack.c.bf16 %v767_v60, %v760_v14 }
  0x6d   :  { %1508 = vmatprep.mubr.msk.f32.mxu0 %vm1973_vm0, %v1974_v1  ;;  %1724 = vmatpush3.bf16.msra.mxu0 %v2080_v59  ;;  %v650_v26 = vand.u32 4294901760, %v602_v17  ;;  %v2179_v15 = vpack.c.bf16 %v755_v13, %v748_v12 }
  0x6e   :  { %1725 = vmatprep.subr.bf16.mxu0 %v1972_v0  ;;  %v769_v18 = vand.u32 4294901760, %v768_v16 }
  0x6f   :  { %1784 = vmatpush3.bf16.msra.mxu1 %v1783_v23  ;;  %v2123_v32 = vsub.f32 %v602_v17, %v650_v26  ;;  %v2145_v41 = vpack.c.bf16 %v650_v26, %v647_v22  ;;  %v762_v17 = vand.u32 4294901760, %v761_v61  ;;  %v774_v22 = vand.u32 4294901760, %v2110_v24 }
  0x70   :  { %1785 = vmatprep.subr.bf16.mxu1 %v1972_v0  ;;  %v782_v26 = vsub.f32 %v2112_v25, %v781_v9  ;;  %v803_v25 = vsub.f32 %v2132_v37, %v802_v47 }
  0x71   :  { %1727 = vmatpush3.bf16.msra.mxu0 %v2091_v5  ;;  %v1789_v36 = vpack.c.bf16 %v2123_v32, %v2119_v30  ;;  %v2185_v23 = vpack.c.bf16 %v769_v18, %v762_v17  ;;  %v775_v10 = vsub.f32 %v2110_v24, %v774_v22  ;;  %v795_v20 = vand.u32 4294901760, %v2123_v32 }
  0x72   :  { %1728 = vmatprep.subr.bf16.mxu0 %v1972_v0  ;;  %v783_v28 = vand.u32 4294901760, %v782_v26  ;;  %v809_v24 = vand.u32 4294901760, %v2134_v38  ;;  %v804_v56 = vand.u32 4294901760, %v803_v25  ;;  %v2213_v3 = vpack.c.bf16 %v781_v9, %v774_v22 }
  0x73   :  { %1787 = vmatpush3.bf16.msra.mxu1 %v1786_v31  ;;  %v776_v27 = vand.u32 4294901760, %v775_v10  ;;  %v788_v31 = vand.u32 4294901760, %v2119_v30  ;;  %v796_v34 = vsub.f32 %v2123_v32, %v795_v20  ;;  %v2207_v32 = vpack.c.bf16 %v739_v62, %v732_v46 }
  0x74   :  { %1788 = vmatprep.subr.bf16.mxu1 %v1972_v0  ;;  %v810_v49 = vsub.f32 %v2134_v38, %v809_v24  ;;  %v2217_v37 = vpack.c.bf16 %v809_v24, %v802_v47  ;;  %v1274_v38 = vld [vmem:[#allocation4 + $0x20] ss:$0 sm:$0xff] }
  0x75   :  { %1730 = vmatpush3.bf16.msra.mxu0 %v2101_v19  ;;  %v2191_v33 = vpack.c.bf16 %v783_v28, %v776_v27  ;;  %v789_v21 = vsub.f32 %v2119_v30, %v788_v31  ;;  %v2205_v30 = vpack.c.bf16 %v725_v54, %v718_v51  ;;  %v2215_v4 = vpack.c.bf16 %v795_v20, %v788_v31  ;;  %v59_v31 = vld [vmem:[#allocation4 + $0x28] sm:$0x1] }
  0x76   :  { %1731 = vmatprep.subr.bf16.mxu0 %v1972_v0  ;;  %v811_v57 = vand.u32 4294901760, %v810_v49  ;;  %v579_v27 = vlaneseq }
  0x77   :  { %1790 = vmatpush3.bf16.msra.mxu1 %v1789_v36  ;;  %v790_v36 = vand.u32 4294901760, %v789_v21 }
  0x78   :  { %1791 = vmatprep.subr.bf16.mxu1 %v1972_v0  ;;  %v2203_v58 = vpack.c.bf16 %v811_v57, %v804_v56  ;;  %v580_v28 = vshrl.u32 %v579_v27, 7 }
  0x79   :  { %1733 = vmatpush3.bf16.msra.mxu0 %v2116_v29 }
  0x7a   :  { %1734 = vmatprep.subr.bf16.mxu0 %v1972_v0  ;;  %v581_v20 = vsub.s32 0, %v580_v28 }
  0x7b   :  { %1793 = vmatpush3.bf16.msra.mxu1 %v1792_v40  ;;  %v797_v40 = vand.u32 4294901760, %v796_v34 }
  0x7c   :  { %1794 = vmatprep.subr.bf16.mxu1 %v1972_v0 }
  0x7d   :  { %1736 = vmatpush3.bf16.msra.mxu0 %v2127_v35  ;;  %v2197_v48 = vpack.c.bf16 %v797_v40, %v790_v36  ;;  %v60_v36 = vld [vmem:[#allocation4 + $0x30] sm:$0x1] }
  0x7e   :  { %1737 = vmatprep.subr.bf16.mxu0 %v1972_v0 }
  0x81   :  { %1739 = vmatpush3.bf16.msra.mxu0 %v2138_v39 }
  0x82   :  { %1740 = vmatprep.subr.bf16.mxu0 %v1972_v0 }
  0x85   :  { %1742 = vmatpush3.bf16.msra.mxu0 %v2145_v41 }
  0x86   :  { %1743 = vmatprep.subr.bf16.mxu0 %v1972_v0 }
  0x89   :  { %1745 = vmatpush3.bf16.msra.mxu0 %v2153_v44 }
  0x8a   :  { %1746 = vmatprep.subr.bf16.mxu0 %v1972_v0 }
 0x13f   :  { %v550_v42 = vpop.f32.mrb[0].mxu0 }
 0x140   :  { %v1866_v43 = vadd.f32 %v1274_v38, %v550_v42  ;;  %v1475_v6 = vpop.f32.mrb[1].mxu0 }
 0x142   :  { %v554_v53 = vmax.f32 %v1866_v43, 0.0 }
 0x144   :  { %v555_v11 = vrot.slane %v554_v53, 4  ;;  %v563_v51 = vmul.f32 %v554_v53, %v554_v53 }
 0x146   :  { %v556_v54 = vadd.f32 %v555_v11, %v554_v53  ;;  %v564_v46 = vrot.slane %v563_v51, 4 }
 0x148   :  { %v557_v62 = vrot.slane %v556_v54, 2  ;;  %v565_v7 = vadd.f32 %v564_v46, %v563_v51 }
 0x14a   :  { %v558_v52 = vadd.f32 %v557_v62, %v556_v54  ;;  %v566_v12 = vrot.slane %v565_v7, 2 }
 0x14c   :  { %v559_v13 = vrot.slane %v558_v52, 1  ;;  %v567_v14 = vadd.f32 %v566_v12, %v565_v7 }
 0x14e   :  { %v560_v60 = vadd.f32 %v559_v13, %v558_v52  ;;  %v568_v61 = vrot.slane %v567_v14, 1 }
 0x150   :  { %v562_v16 = vmul.f32 0.125, %v560_v60  ;;  %v569_v17 = vadd.f32 %v568_v61, %v567_v14 }
 0x152   :  { %v570_v18 = vmul.f32 0.125, %v569_v17  ;;  %v571_v22 = vmul.f32 %v562_v16, %v562_v16 }
 0x154   :  { %v572_v9 = vsub.f32 %v570_v18, %v571_v22 }
 0x156   :  { %v573_v10 = vmax.f32 %v572_v9, 0.0 }
 0x158   :  { %v574_v26 = vadd.f32 1e-05, %v573_v10 }
 0x15a   :  { %1895 = vrsqrt.f32 %v574_v26 }
 0x164   :  { %v1896_v21 = vpop.eup %1895 }
 0x165   :  { %v576_v34 = vmul.f32 %v1896_v21, %v59_v31 }
 0x167   :  { %v577_v40 = vmul.f32 %v576_v34, %v562_v16  ;;  %v582_v47 = vrot.slane %v576_v34, %v581_v20 }
 0x169   :  { %v578_v24 = vsub.f32 %v60_v36, %v577_v40  ;;  %v583_v25 = vmul.f32 %v582_v47, %v554_v53 }
 0x16b   :  { %v587_v49 = vrot.slane %v578_v24, %v581_v20 }
 0x16d   :  { %v588_v56 = vadd.f32 %v587_v49, %v583_v25 }
 0x16f   :  { %v2219_v57 = vand.u32 4294901760, %v588_v56 }
 0x171   :  { %v692_v38 = vsub.f32 %v588_v56, %v2219_v57 }
 0x173   :  { %v693_v42 = vand.u32 4294901760, %v692_v38  ;;  %1579 = vmatmul.mubr.f32.vlgmr.msra.gmra.mrb[0].mxu1 %v692_v38 }
 0x174   :  { %1796 = vmatpush3.bf16.msra.mxu1 %v2080_v59  ;;  %1613 = vmatprep.mubr.msk.f32.mxu1 %vm1973_vm0, %v1974_v1 }
 0x175   :  { %1797 = vmatprep.subr.bf16.mxu1 %v1972_v0  ;;  %v694_v43 = vsub.f32 %v692_v38, %v693_v42 }
 0x177   :  { %v695_v6 = vand.u32 4294901760, %v694_v43 }
 0x178   :  { %1799 = vmatpush3.bf16.msra.mxu1 %v2091_v5 }
 0x179   :  { %1509 = vmatmul.mubr.f32.vlgmr.msra.gmra.mrb[2].mxu0 %v695_v6  ;;  %1800 = vmatprep.subr.bf16.mxu1 %v1972_v0 }
 0x17a   :  { %1748 = vmatpush3.bf16.msra.mxu0 %v2161_v55  ;;  %1543 = vmatprep.mubr.msk.f32.mxu0 %vm1973_vm0, %v1974_v1 }
 0x17b   :  { %1749 = vmatprep.subr.bf16.mxu0 %v1972_v0 }
 0x17c   :  { %1802 = vmatpush3.bf16.msra.mxu1 %v2101_v19 }
 0x17d   :  { %1803 = vmatprep.subr.bf16.mxu1 %v1972_v0 }
 0x17e   :  { %1751 = vmatpush3.bf16.msra.mxu0 %v2167_v63  ;;  %v1276_v63 = vld [vmem:[#allocation6 + $0x81] ss:$0 sm:$0xff] }
 0x17f   :  { %1752 = vmatprep.subr.bf16.mxu0 %v1972_v0 }
 0x180   :  { %1805 = vmatpush3.bf16.msra.mxu1 %v2116_v29 }
 0x181   :  { %1806 = vmatprep.subr.bf16.mxu1 %v1972_v0 }
 0x182   :  { %1754 = vmatpush3.bf16.msra.mxu0 %v2173_v8 }
 0x183   :  { %1755 = vmatprep.subr.bf16.mxu0 %v1972_v0 }
 0x184   :  { %1808 = vmatpush3.bf16.msra.mxu1 %v2127_v35 }
 0x185   :  { %1809 = vmatprep.subr.bf16.mxu1 %v1972_v0 }
 0x186   :  { %1757 = vmatpush3.bf16.msra.mxu0 %v2179_v15  ;;  %v1277_v15 = vld [vmem:[#allocation6 + $0x82] ss:$0 sm:$0xff] }
 0x187   :  { %1758 = vmatprep.subr.bf16.mxu0 %v1972_v0 }
 0x188   :  { %1811 = vmatpush3.bf16.msra.mxu1 %v2138_v39 }
 0x189   :  { %1812 = vmatprep.subr.bf16.mxu1 %v1972_v0 }
 0x18a   :  { %1760 = vmatpush3.bf16.msra.mxu0 %v2185_v23 }
 0x18b   :  { %1761 = vmatprep.subr.bf16.mxu0 %v1972_v0 }
 0x18c   :  { %1814 = vmatpush3.bf16.msra.mxu1 %v2145_v41 }
 0x18d   :  { %1815 = vmatprep.subr.bf16.mxu1 %v1972_v0 }
 0x18e   :  { %1763 = vmatpush3.bf16.msra.mxu0 %v2191_v33 }
 0x18f   :  { %1764 = vmatprep.subr.bf16.mxu0 %v1972_v0 }
 0x190   :  { %1817 = vmatpush3.bf16.msra.mxu1 %v2153_v44 }
 0x191   :  { %1818 = vmatprep.subr.bf16.mxu1 %v1972_v0 }
 0x192   :  { %1766 = vmatpush3.bf16.msra.mxu0 %v2197_v48 }
 0x193   :  { %1614 = vmatmul.mubr.f32.vlgmr.msra.gmra.mrb[0].mxu1 %v693_v42  ;;  %1767 = vmatprep.subr.bf16.mxu0 %v1972_v0 }
 0x194   :  { %1820 = vmatpush3.bf16.msra.mxu1 %v2201_v50  ;;  %1648 = vmatprep.mubr.msk.f32.mxu1 %vm1973_vm0, %v1974_v1 }
 0x195   :  { %1821 = vmatprep.subr.bf16.mxu1 %v1972_v0 }
 0x196   :  { %1769 = vmatpush3.bf16.msra.mxu0 %v2203_v58 }
 0x198   :  { %1823 = vmatpush3.bf16.msra.mxu1 %v2205_v30 }
 0x199   :  { %1544 = vmatmul.mubr.f32.vlgmr.msra.gmra.mrb[2].mxu0 %v2219_v57  ;;  %1824 = vmatprep.subr.bf16.mxu1 %v1972_v0 }
 0x19c   :  { %1826 = vmatpush3.bf16.msra.mxu1 %v2207_v32 }
 0x19d   :  { %1827 = vmatprep.subr.bf16.mxu1 %v1972_v0 }
 0x1a0   :  { %1829 = vmatpush3.bf16.msra.mxu1 %v2209_v45 }
 0x1a1   :  { %1830 = vmatprep.subr.bf16.mxu1 %v1972_v0 }
 0x1a4   :  { %1832 = vmatpush3.bf16.msra.mxu1 %v2211_v2 }
 0x1a5   :  { %1833 = vmatprep.subr.bf16.mxu1 %v1972_v0 }
 0x1a8   :  { %1835 = vmatpush3.bf16.msra.mxu1 %v2213_v3 }
 0x1a9   :  { %1836 = vmatprep.subr.bf16.mxu1 %v1972_v0 }
 0x1ac   :  { %1838 = vmatpush3.bf16.msra.mxu1 %v2215_v4 }
 0x1ad   :  { %1839 = vmatprep.subr.bf16.mxu1 %v1972_v0 }
 0x1b0   :  { %1841 = vmatpush3.bf16.msra.mxu1 %v2217_v37 }
 0x1b1   :  { %1842 = vmatprep.subr.bf16.mxu1 %v1972_v0 }
 0x1b3   :  { %1649 = vmatmul.mubr.f32.vlgmr.msra.gmra.mrb[0].mxu1 %v2219_v57 }
 0x1b4   :  { %1844 = vmatpush3.bf16.msra.mxu1 %v2080_v59  ;;  %1683 = vmatprep.mubr.msk.f32.mxu1 %vm1973_vm0, %v1974_v1 }
 0x1b5   :  { %1845 = vmatprep.subr.bf16.mxu1 %v1972_v0 }
 0x1b8   :  { %1847 = vmatpush3.bf16.msra.mxu1 %v2091_v5  ;;  %v1275_v5 = vld [vmem:[#allocation6 + $0x80] ss:$0 sm:$0xff] }
 0x1b9   :  { %1848 = vmatprep.subr.bf16.mxu1 %v1972_v0 }
 0x1bc   :  { %1850 = vmatpush3.bf16.msra.mxu1 %v2101_v19 }
 0x1bd   :  { %1851 = vmatprep.subr.bf16.mxu1 %v1972_v0 }
 0x1c0   :  { %1853 = vmatpush3.bf16.msra.mxu1 %v2116_v29 }
 0x1c1   :  { %1854 = vmatprep.subr.bf16.mxu1 %v1972_v0 }
 0x1c4   :  { %1856 = vmatpush3.bf16.msra.mxu1 %v2127_v35 }
 0x1c5   :  { %1857 = vmatprep.subr.bf16.mxu1 %v1972_v0 }
 0x1c8   :  { %1859 = vmatpush3.bf16.msra.mxu1 %v2138_v39 }
 0x1c9   :  { %1860 = vmatprep.subr.bf16.mxu1 %v1972_v0 }
 0x1cc   :  { %1862 = vmatpush3.bf16.msra.mxu1 %v2145_v41 }
 0x1cd   :  { %1863 = vmatprep.subr.bf16.mxu1 %v1972_v0 }
 0x1d0   :  { %1865 = vmatpush3.bf16.msra.mxu1 %v2153_v44 }
 0x1d3   :  { %1684 = vmatmul.mubr.f32.vlgmr.msra.gmra.mrb[0].mxu1 %v2219_v57 }
 0x26c   :  { %v848_v1 = vpop.f32.mrb[2].mxu0 }
 0x26d   :  { %v1545_v59 = vpop.f32.mrb[3].mxu0  ;;  %v1867_v19 = vadd.f32 %v1275_v5, %v848_v1 }
 0x2a6   :  { %v1247_v29 = vpop.f32.mrb[0].mxu1 }
 0x2a7   :  { %v1868_v35 = vadd.f32 %v1867_v19, %v1247_v29  ;;  %v1685_v55 = vpop.f32.mrb[1].mxu1 }
 0x2a9   :  { %v1251_v8 = vmax.f32 %v1868_v35, 0.0 }
 0x2ab   :  { %v1258_v39 = vmul.f32 %v1276_v63, %v1251_v8 }
 0x2ad   :  { %1259 = vadd.xlane.f32.xlu0 %v1258_v39 }
 0x33a   :  { %v1260_v23 = vpop.xlane.xlu0 %1259 }
 0x33b   :  { %v1265_v41 = vadd.f32 %v1277_v15, %v1260_v23 }
 0x33d   :  { %1267 = vst.msk [vmem:[%s2301_s3] sm:$0xff] %vm1266_vm2, %v1265_v41 }
 0x33e   :  { %1272 = vsyncpa [#allocation3], 1 }
 0x33f   :  { %1273 = vsyncpa [#allocation5], 1 }

</bundles_post_ra>
